<compile_context>
chip_gen: v6e
topology: v6e:2x2x1
jax: 0.10.0
libtpu: 0.0.40
codegen_flags: <defaults>
</compile_context>

<pallas_src>
import jax
import jax.numpy as jnp
from jax.experimental import pallas as pl
from jax.experimental.pallas import tpu as pltpu

_MiB = 1024 * 1024


def _round_up(x, m):
    return (x + m - 1) // m * m


def _vmem_capacity_bytes():
    try:
        return int(pltpu.get_tpu_info().vmem_capacity_bytes)
    except Exception:
        return 64 * _MiB  # conservative: v7x per-TC VMEM


def _num_tensorcores():
    """Best-effort TensorCores-per-chip: only multi-TC chips benefit from the
    megacore grid-splitting guard."""
    try:
        kind = jax.devices()[0].device_kind.lower()
    except Exception:
        return 1
    if any(t in kind for t in ("v5 lite", "v5e", "v6e", "v6 lite")):
        return 1
    if any(t in kind for t in ("v7", "7x", "v4", "v5p")):
        return 2
    return 1


# --------------------------- kernel bodies ----------------------------------


def _rpl_bias_kernel(x_ref, w_ref, b_ref, o_ref):
    """One (tm, tn) fp32 output tile.  Accumulates directly into o_ref across
    the K grid axis (output block is resident); bias folded into the k==0 init."""
    @pl.when(pl.program_id(2) == 0)
    def _():
        o_ref[...] = jnp.broadcast_to(b_ref[...], o_ref.shape).astype(o_ref.dtype)

    o_ref[...] += jnp.dot(x_ref[...], w_ref[...],
                          preferred_element_type=jnp.float32)


def _rpl_kernel(x_ref, w_ref, o_ref):
    """Same as above, without the bias operand / init."""
    @pl.when(pl.program_id(2) == 0)
    def _():
        o_ref[...] = jnp.zeros_like(o_ref)

    o_ref[...] += jnp.dot(x_ref[...], w_ref[...],
                          preferred_element_type=jnp.float32)


# ----------------------------- wrapper ---------------------------------------


@jax.jit
def row_parallel_linear(x, weight_t, bias=None):
    """y = x @ weight_t (+ bias), fp32 output.

    weight_t: (Kp, out_features) with Kp = round_up(in_features, 128), already
              transposed / K-zero-padded / cast to the compute dtype at init.
    """
    orig_shape = x.shape
    K = orig_shape[-1]
    Kp, N = weight_t.shape
    assert Kp % 128 == 0 and Kp >= K, "weight_t must be (round_up(K,128), N)"

    cdtype = weight_t.dtype
    in_itemsize = jnp.dtype(cdtype).itemsize

    x2d = x.reshape(-1, K)
    M = x2d.shape[0]
    if x2d.dtype != cdtype:
        x2d = x2d.astype(cdtype)          # bf16 MXU operands, fp32 accumulation
    if Kp != K:
        # Zero-padding on the contraction axis is numerically inert and is the
        # only padding the kernel needs (M / N ragged edges are masked blocks).
        x2d = jnp.pad(x2d, ((0, 0), (0, Kp - K)))

    # ---------------------------- tile selection -----------------------------
    if M <= 512:
        tm = max(16, _round_up(M, 16))    # 16: bf16 sublane packing
    else:
        tm = 512

    tn = None
    for c in (1024, 512, 256, 128):
        if N % c == 0:
            tn = c
            break
    if tn is None:
        tn = min(512, _round_up(N, 128))  # ragged N edge handled by masking

    grid_i = pl.cdiv(M, tm)
    grid_j = pl.cdiv(N, tn)

    # Megacore guard: only multi-TC chips (v7x) benefit from splitting N to
    # give both cores work; never shrink below tn=256.
    if _num_tensorcores() > 1:
        while grid_i * grid_j < 2 and tn >= 512 and tn % 256 == 0:
            tn //= 2
            grid_j = pl.cdiv(N, tn)

    weight_streaming = grid_i == 1              # small-M: HBM-bound on W stream
    deep_pipeline = weight_streaming and grid_j >= 4
    w_bufs = 3 if deep_pipeline else 2

    vmem_cap = _vmem_capacity_bytes()
    budget = max(24 * _MiB, min(int(vmem_cap * 0.6), vmem_cap - 16 * _MiB))

    has_bias = bias is not None

    def footprint(tk):
        fp = (2 * tm * tk * in_itemsize         # x tiles (double-buffered)
              + w_bufs * tk * tn * in_itemsize  # W^T tiles
              + 2 * tm * tn * 4)                # fp32 output tiles
        if has_bias:
            fp += 2 * tn * 4
        return fp

    tk_candidates = []
    if weight_streaming:
        tk_candidates.append(Kp)                # hold the full K slab resident
    for c in (2048, 1024, 512, 256, 128):
        if Kp % c == 0 and c <= Kp and c not in tk_candidates:
            tk_candidates.append(c)
    tk = tk_candidates[-1]                      # 128 always divides Kp
    for c in tk_candidates:
        if footprint(c) <= budget:
            tk = c
            break
    grid_k = Kp // tk

    fp_bytes = footprint(tk)
    # Footprint + fixed headroom for Mosaic internal scratch / semaphores;
    # never request the full physical VMEM (matters on v7x's 64 MiB).
    vmem_limit = int(min(vmem_cap - 8 * _MiB, fp_bytes + 16 * _MiB))
    vmem_limit = max(vmem_limit, fp_bytes + 2 * _MiB)

    # ------------------------------ specs ------------------------------------
    def make_w_spec():
        if deep_pipeline:
            try:
                return pl.BlockSpec((tk, tn), lambda i, j, k: (k, j),
                                    pipeline_mode=pl.Buffered(3))
            except (TypeError, AttributeError):
                pass
        return pl.BlockSpec((tk, tn), lambda i, j, k: (k, j))

    in_specs = [
        pl.BlockSpec((tm, tk), lambda i, j, k: (i, k)),   # x tile
        make_w_spec(),                                    # W^T tile
    ]
    operands = [x2d, weight_t]
    if has_bias:
        in_specs.append(pl.BlockSpec((1, tn), lambda i, j, k: (0, j)))
        operands.append(bias.reshape(1, N).astype(jnp.float32))

    kernel = _rpl_bias_kernel if has_bias else _rpl_kernel

    out = pl.pallas_call(
        kernel,
        out_shape=jax.ShapeDtypeStruct((M, N), jnp.float32),
        grid_spec=pltpu.PrefetchScalarGridSpec(
            num_scalar_prefetch=0,
            grid=(grid_i, grid_j, grid_k),
            in_specs=in_specs,
            out_specs=pl.BlockSpec((tm, tn), lambda i, j, k: (i, j)),
        ),
        compiler_params=pltpu.CompilerParams(
            dimension_semantics=("parallel", "parallel", "arbitrary"),
            vmem_limit_bytes=vmem_limit,
        ),
    )(*operands)

    return out.reshape(*orig_shape[:-1], N)


class RowParallelLinearJax:
    """Deterministically-initialized stand-in for RowParallelLinear."""

    def __init__(self, in_features, out_features, bias=False,
                 compute_dtype=jnp.bfloat16, key=None):
        key = jax.random.PRNGKey(0) if key is None else key
        kw, kb = jax.random.split(key)
        self.in_features = in_features
        self.out_features = out_features
        # Module-semantics (fp32) reference weight: (out_features, in_features).
        self.weight = (jax.random.normal(kw, (out_features, in_features),
                                         dtype=jnp.float32)
                       * (1.0 / in_features ** 0.5))
        # Pre-transpose, zero-pad K to a lane multiple and cast to the MXU
        # compute dtype ONCE at init -> nothing of this in the per-call path.
        Kp = _round_up(in_features, 128)
        w_t = self.weight.T                              # (K, N)
        if Kp != in_features:
            w_t = jnp.pad(w_t, ((0, Kp - in_features), (0, 0)))
        self.weight_t = jnp.asarray(w_t, dtype=compute_dtype)
        self.bias = (jax.random.normal(kb, (out_features,), dtype=jnp.float32)
                     if bias else None)

    def __call__(self, x):
        return row_parallel_linear(x, self.weight_t, self.bias)


if __name__ == "__main__":
    batch, seq = 2, 8
    in_features, out_features = 128, 256

    key = jax.random.PRNGKey(0)
    kx, kmod = jax.random.split(key)
    x = jax.random.normal(kx, (batch, seq, in_features), dtype=jnp.float32)

    layer = RowParallelLinearJax(in_features, out_features, bias=True, key=kmod)
    y = jax.block_until_ready(layer(x))
    assert y.shape == (batch, seq, out_features)

    # Reference matching the kernel's precision policy (bf16 operands, fp32 acc).
    y_ref = jnp.einsum("bsk,kn->bsn", x.astype(jnp.bfloat16),
                       layer.weight.T.astype(jnp.bfloat16),
                       preferred_element_type=jnp.float32) + layer.bias
    assert jnp.allclose(y, y_ref, atol=1e-4, rtol=1e-4), "mismatch vs bf16 ref"

    # Sanity vs. exact fp32 module semantics (looser: bf16 operand rounding).
    y_fp32 = jnp.einsum("bsk,nk->bsn", x, layer.weight) + layer.bias
    assert jnp.allclose(y, y_fp32, atol=5e-2, rtol=5e-2), "mismatch vs fp32 ref"

    # No-bias variant with ragged (non-tile-multiple) M / N / K: exercises the
    # masked edge-block path (no jnp.pad on M/N, no output slice) and K padding.
    layer_nb = RowParallelLinearJax(96, 192, bias=False, key=kmod)
    x2 = jax.random.normal(kx, (2, 5, 96), dtype=jnp.float32)
    y2 = jax.block_until_ready(layer_nb(x2))
    y2_ref = jnp.einsum("bsk,kn->bsn", x2.astype(jnp.bfloat16),
                        layer_nb.weight.T.astype(jnp.bfloat16),
                        preferred_element_type=jnp.float32)
    assert y2.shape == (2, 5, 192)
    assert jnp.allclose(y2, y2_ref, atol=1e-4, rtol=1e-4), "mismatch (ragged)"

    print("KERNEL_OK")
</pallas_src>

<mosaic_0001>
module attributes {stable_mosaic.version = 11 : i64} {
  func.func @_rpl_bias_kernel(%arg0: i32, %arg1: i32, %arg2: i32, %arg3: memref<16x128xbf16, #tpu.memory_space<vmem>>, %arg4: memref<128x256xbf16, #tpu.memory_space<vmem>>, %arg5: memref<1x256xf32, #tpu.memory_space<vmem>>, %arg6: memref<16x256xf32, #tpu.memory_space<vmem>>) attributes {dimension_semantics = [#tpu.dimension_semantics<parallel>, #tpu.dimension_semantics<parallel>, #tpu.dimension_semantics<arbitrary>], iteration_bounds = array<i64: 1, 1, 1>, scalar_prefetch = 0 : i64, scratch_operands = 0 : i64, tpu.core_type = #tpu.core_type<tc>, window_params = [{transform_indices = @transform_0, window_bounds = array<i64: 16, 128>}, {transform_indices = @transform_1, window_bounds = array<i64: 128, 256>}, {transform_indices = @transform_2, window_bounds = array<i64: 1, 256>}, {transform_indices = @transform_3, window_bounds = array<i64: 16, 256>}]} {
    %c0_i32 = arith.constant 0 : i32
    %0 = arith.cmpi eq, %arg2, %c0_i32 : i32
    %1 = arith.extui %0 : i1 to i32
    %c0_i32_0 = arith.constant 0 : i32
    %2 = arith.cmpi ne, %1, %c0_i32_0 : i32
    scf.if %2 {
      %c0_8 = arith.constant 0 : index
      %c0_9 = arith.constant 0 : index
      %9 = vector.load %arg5[%c0_8, %c0_9] : memref<1x256xf32, #tpu.memory_space<vmem>>, vector<1x256xf32>
      %10 = vector.shape_cast %9 : vector<1x256xf32> to vector<1x256xf32>
      %11 = vector.broadcast %10 : vector<1x256xf32> to vector<16x256xf32>
      %c0_10 = arith.constant 0 : index
      %c0_11 = arith.constant 0 : index
      %12 = vector.load %arg6[%c0_10, %c0_11] : memref<16x256xf32, #tpu.memory_space<vmem>>, vector<16x256xf32>
      tpu.vector_store %arg6[%c0_10, %c0_11], %11 {strides = array<i32>} : memref<16x256xf32, #tpu.memory_space<vmem>>, vector<16x256xf32>,
    } else {
    }
    %c0 = arith.constant 0 : index
    %c0_1 = arith.constant 0 : index
    %3 = vector.load %arg6[%c0, %c0_1] : memref<16x256xf32, #tpu.memory_space<vmem>>, vector<16x256xf32>
    %c0_2 = arith.constant 0 : index
    %c0_3 = arith.constant 0 : index
    %4 = vector.load %arg3[%c0_2, %c0_3] : memref<16x128xbf16, #tpu.memory_space<vmem>>, vector<16x128xbf16>
    %c0_4 = arith.constant 0 : index
    %c0_5 = arith.constant 0 : index
    %5 = vector.load %arg4[%c0_4, %c0_5] : memref<128x256xbf16, #tpu.memory_space<vmem>>, vector<128x256xbf16>
    %cst = arith.constant dense<0.000000e+00> : vector<16x256xf32>
    %6 = tpu.matmul %4, %5, %cst {dimension_numbers = #tpu.dot_dimension_numbers<[1], [0], [0], [1], [0, 0, 1, 1], [], []>} : vector<16x128xbf16>, vector<128x256xbf16>, vector<16x256xf32> -> vector<16x256xf32>
    %7 = arith.addf %3, %6 : vector<16x256xf32>
    %c0_6 = arith.constant 0 : index
    %c0_7 = arith.constant 0 : index
    %8 = vector.load %arg6[%c0_6, %c0_7] : memref<16x256xf32, #tpu.memory_space<vmem>>, vector<16x256xf32>
    tpu.vector_store %arg6[%c0_6, %c0_7], %7 {strides = array<i32>} : memref<16x256xf32, #tpu.memory_space<vmem>>, vector<16x256xf32>,
    return
  }
  func.func @transform_0(%arg0: i32, %arg1: i32, %arg2: i32) -> (i32, i32) {
    %c0_i32 = arith.constant 0 : i32
    return %arg0, %arg2 : i32, i32
  }
  func.func @transform_1(%arg0: i32, %arg1: i32, %arg2: i32) -> (i32, i32) {
    %c0_i32 = arith.constant 0 : i32
    return %arg2, %arg1 : i32, i32
  }
  func.func @transform_2(%arg0: i32, %arg1: i32, %arg2: i32) -> (i32, i32) {
    %c0_i32 = arith.constant 0 : i32
    %c0_i32_0 = arith.constant 0 : i32
    return %c0_i32, %arg1 : i32, i32
  }
  func.func @transform_3(%arg0: i32, %arg1: i32, %arg2: i32) -> (i32, i32) {
    %c0_i32 = arith.constant 0 : i32
    return %arg0, %arg1 : i32, i32
  }
}

</mosaic_0001>

<bundles_post_ra>
// kernel: row_parallel_linear.1
= control target key start
LH: loop header
LB: loop body
LE: loop exit
PB: predicated region body
PF: predicated region fallthrough
CT: control target
= control target key end

     0   :  { %8 = vsyncpa [#allocation3], 0  ;;  %s358_s0 = inlined_call_operand.vmem [shape: bf16[16,128], index: 0, kind: input, shape index: {}]   ;;  %s359_s1 = inlined_call_operand.hbm [shape: bf16[128,256], index: 1, kind: input, shape index: {}]   ;;  %s360_s2 = inlined_call_operand.vmem [shape: f32[1,256], index: 2, kind: input, shape index: {}]   ;;  %s361_s3 = inlined_call_operand.hbm [shape: f32[16,256], index: 3, kind: output, shape index: {}]  }
   0x1   :  { %9 = vsyncpa [#allocation4], 0  ;;  %s319_s12 = smov [#allocation2]  }
   0x2   :  { %s17_s13 = sshll.u32 %s319_s12, 4  ;;  %s18_s13 = int_to_ptr.vmem [resolvable:$true] %s17_s13 }
   0x3   :  { %s283_s14 = scalar_lea.vmem %s18_s13, 2048  ;;  %p288_p1 = scmp.lt.s32.totalorder %s18_s13, %s18_s13 }
   0x4   :  { %p284_p0 = scmp.ne.s32.totalorder %s18_s13, %s283_s14  ;;  %p289_p2 = scmp.lt.s32.totalorder %s283_s14, %s283_s14 }
   0x6   :  { %p290_p3 = por %p289_p2, %p288_p1 }
   0x8   :  { %p291_p4 = pnand %p290_p3, %p284_p0 }
   0xa   :  { %294 = shalt.err (!%p291_p4)
}
   0xb   :  { %s320_s15 = smov 128   ;;  %s321_s16 = smov 8  }
   0xc   :  { %23 = dma.hbm_to_vmem [thread:$0]  %s359_s1, 2048, %s18_s13, [#allocation3], %s320_s15, %s320_s15, %s321_s16  }
   0xd   :  { %315 = dma.done.wait [#allocation3], 2048  }
   0xe   :  { %316 = vsyncadd [#allocation3], 4294965248  ;;  %v322_v0 = vmov 0   ;;  %v250_v1 = vld [vmem:[#allocation2 + $0x74] ss:$8 sps:$4 sm:$0xff]   ;;  %v274_v17 = vld [vmem:[%s358_s0] sm:$0xff]   ;;  %v36_v18 = vlaneseq }
   0xf   :  { %190 = vmatprep.mubr.bf16.mxu0 %v322_v0  ;;  %v252_v2 = vld [vmem:[#allocation2 + $0x70] ss:$8 sps:$4 sm:$0xff]   ;;  %158 = vmatprep.subr.bf16.mxu0 %v250_v1  ;;  %v253_v3 = vld [vmem:[#allocation2 + $0x64] ss:$8 sps:$4 sm:$0xff]   ;;  %v255_v4 = vld [vmem:[#allocation2 + $0x60] ss:$8 sps:$4 sm:$0xff]  }
  0x10   :  { %159 = vmatpush1.bf16.msra.mxu0 %v252_v2  ;;  %v256_v5 = vld [vmem:[#allocation2 + $0x54] ss:$8 sps:$4 sm:$0xff]   ;;  %v258_v6 = vld [vmem:[#allocation2 + $0x50] ss:$8 sps:$4 sm:$0xff]   ;;  %v259_v7 = vld [vmem:[#allocation2 + $0x44] ss:$8 sps:$4 sm:$0xff]  }
  0x11   :  { %160 = vmatprep.subr.bf16.mxu0 %v253_v3  ;;  %v261_v8 = vld [vmem:[#allocation2 + $0x40] ss:$8 sps:$4 sm:$0xff]   ;;  %v262_v9 = vld [vmem:[#allocation2 + $0x34] ss:$8 sps:$4 sm:$0xff]   ;;  %v264_v10 = vld [vmem:[#allocation2 + $0x30] ss:$8 sps:$4 sm:$0xff]  }
  0x12   :  { %v265_v11 = vld [vmem:[#allocation2 + $0x24] ss:$8 sps:$4 sm:$0xff]   ;;  %v267_v12 = vld [vmem:[#allocation2 + $0x20] ss:$8 sps:$4 sm:$0xff]   ;;  %v268_v13 = vld [vmem:[#allocation2 + $0x14] ss:$8 sps:$4 sm:$0xff]  }
  0x13   :  { %v270_v14 = vld [vmem:[#allocation2 + $0x10] ss:$8 sps:$4 sm:$0xff]   ;;  %v271_v15 = vld [vmem:[#allocation2 + $0x4] ss:$8 sps:$4 sm:$0xff]   ;;  %v273_v16 = vld [vmem:[#allocation2] ss:$8 sps:$4 sm:$0xff]  }
  0x14   :  { %161 = vmatpush1.bf16.msra.mxu0 %v255_v4  ;;  %v37_v19 = vshrl.u32 %v36_v18, 7  ;;  %v34_v21 = vld [vmem:[%s360_s2] sm:$0x3]  ;;  %s323_s22 = smov [#allocation5]  }
  0x15   :  { %162 = vmatprep.subr.bf16.mxu0 %v256_v5  ;;  %s214_s23 = sshll.u32 %s323_s22, 4  ;;  %s215_s23 = int_to_ptr.vmem [resolvable:$true] %s214_s23 }
  0x16   :  { %v38_v20 = vsub.s32 0, %v37_v19  ;;  %v42_v22 = vsub.s32 1, %v37_v19  ;;  %s295_s0 = scalar_lea.vmem %s215_s23, 512  ;;  %p300_p6 = scmp.lt.s32.totalorder %s215_s23, %s215_s23 }
  0x17   :  { %p296_p5 = scmp.ne.s32.totalorder %s215_s23, %s295_s0  ;;  %p301_p7 = scmp.lt.s32.totalorder %s295_s0, %s295_s0 }
  0x18   :  { %163 = vmatpush1.bf16.msra.mxu0 %v258_v6  ;;  %v39_v23 = vrot.slane %v34_v21, %v38_v20  ;;  %v43_v24 = vrot.slane %v34_v21, %v42_v22 }
  0x19   :  { %164 = vmatprep.subr.bf16.mxu0 %v259_v7  ;;  %p302_p8 = por %p301_p7, %p300_p6 }
  0x1b   :  { %p303_p9 = pnand %p302_p8, %p296_p5 }
  0x1c   :  { %165 = vmatpush1.bf16.msra.mxu0 %v261_v8 }
  0x1d   :  { %166 = vmatprep.subr.bf16.mxu0 %v262_v9 }
  0x20   :  { %167 = vmatpush1.bf16.msra.mxu0 %v264_v10 }
  0x21   :  { %168 = vmatprep.subr.bf16.mxu0 %v265_v11 }
  0x24   :  { %169 = vmatpush1.bf16.msra.mxu0 %v267_v12 }
  0x25   :  { %170 = vmatprep.subr.bf16.mxu0 %v268_v13 }
  0x28   :  { %171 = vmatpush1.bf16.msra.mxu0 %v270_v14 }
  0x29   :  { %172 = vmatprep.subr.bf16.mxu0 %v271_v15 }
  0x2c   :  { %173 = vmatpush1.bf16.msra.mxu0 %v273_v16 }
  0x2f   :  { %191 = vmatmul.mubr.bf16.vlgmr.msra.gmra.mxu0 %v274_v17 }
  0xef   :  { %v192_v25 = vpop.f32.mrf.mxu0 }
  0xf0   :  { %v201_v26 = vadd.f32 %v192_v25, %v39_v23 }
  0xf1   :  { %v194_v27 = vpop.f32.mrf.mxu0 }
  0xf2   :  { %205 = vst [vmem:[#allocation5] sm:$0xff] %v201_v26  ;;  %v202_v28 = vadd.f32 %v194_v27, %v43_v24 }
  0xf3   :  { %v196_v29 = vpop.f32.mrf.mxu0 }
  0xf4   :  { %206 = vst [vmem:[#allocation5 + $0x8] sm:$0xff] %v202_v28  ;;  %v203_v30 = vadd.f32 %v196_v29, %v39_v23 }
  0xf5   :  { %v198_v31 = vpop.f32.mrf.mxu0 }
  0xf6   :  { %207 = vst [vmem:[#allocation5 + $0x10] sm:$0xff] %v203_v30  ;;  %v204_v32 = vadd.f32 %v198_v31, %v43_v24 }
  0xf8   :  { %208 = vst [vmem:[#allocation5 + $0x18] sm:$0xff] %v204_v32 }
  0xf9   :  { %306 = shalt.err (!%p303_p9)
}
  0xfa   :  { %s324_s2 = smov 256   ;;  %s325_s24 = smov 16  }
  0xfb   :  { %220 = dma.vmem_to_hbm [thread:$0]  %s215_s23, 512, %s361_s3, [#allocation4], %s324_s2, %s324_s2, %s325_s24  }
  0xfc   :  { %317 = dma.done.wait [#allocation4], 512  }
  0xfd   :  { %318 = vsyncadd [#allocation4], 4294966784 }
  0xfe   :  { %224 = vsyncpa [#allocation3], 1 }
  0xff   :  { %225 = vsyncpa [#allocation4], 1 }

</bundles_post_ra>
